<compile_context>
chip_gen: v6e
topology: v6e:2x2x1
jax: 0.10.0
libtpu: 0.0.40
codegen_flags: <defaults>
</compile_context>

<pallas_src>
import functools

import jax
import jax.numpy as jnp
from jax.experimental import pallas as pl
from jax.experimental.pallas import tpu as pltpu


def _round_up(x, m):
    return ((x + m - 1) // m) * m


def _cdiv(a, b):
    return (a + b - 1) // b


def _stats_pool_kernel(x_ref, mean_ref, m2_ref, mean_acc, m2_acc, *,
                       t_total, t_block, tiles_per_split, ragged):
    """Accumulate per-row (mean, M2) over the lane (T) axis via Chan's combine."""
    s = pl.program_id(0)          # T-split (core) index        (parallel)
    k = pl.program_id(2)          # T tile index within split   (arbitrary, innermost)

    @pl.when(k == 0)
    def _init():
        mean_acc[...] = jnp.zeros_like(mean_acc)
        m2_acc[...] = jnp.zeros_like(m2_acc)

    base = s * (tiles_per_split * t_block)            # first element of this split
    # Elements this split has already folded in: within a split all full tiles
    # come first, then (at most) one partial tile, then empty ones -> clamp.
    n_a = jnp.minimum(jnp.maximum(t_total - base, 0),
                      k * t_block).astype(jnp.float32)
    rem = t_total - base - k * t_block                # valid elements from this tile on

    x = x_ref[...].astype(jnp.float32)                # (rb, tb)
    rb, tb = x.shape

    def _combine(xm, n_b, mask=None):
        tile_sum = jnp.sum(xm, axis=-1, keepdims=True)          # (rb, 1)
        tile_mean = tile_sum / n_b
        centered = xm - tile_mean
        if mask is not None:
            centered = jnp.where(mask, centered, 0.0)
        tile_m2 = jnp.sum(centered * centered, axis=-1, keepdims=True)
        mean_a = mean_acc[...]
        m2_a = m2_acc[...]
        n = n_a + n_b
        delta = tile_mean - mean_a
        mean_acc[...] = mean_a + delta * (n_b / n)
        m2_acc[...] = m2_a + tile_m2 + (delta * delta) * (n_a * n_b / n)

    if ragged:
        # Mask-free fast path for interior (full) tiles.
        @pl.when(rem >= t_block)
        def _full():
            _combine(x, jnp.float32(t_block))

        # Masked path: only the final real tile of a split takes this branch.
        @pl.when(jnp.logical_and(rem > 0, rem < t_block))
        def _partial():
            col = jax.lax.broadcasted_iota(jnp.int32, (rb, tb), 1)
            valid = col < rem
            xm = jnp.where(valid, x, 0.0)     # OOB lanes hold undefined VMEM data
            _combine(xm, rem.astype(jnp.float32), mask=valid)
        # rem <= 0: fully out-of-range tile (odd tile count per split) -> skip.
    else:
        _combine(x, jnp.float32(t_block))

    @pl.when(k == pl.num_programs(2) - 1)
    def _finalize():
        mean_ref[...] = mean_acc[...]
        m2_ref[...] = m2_acc[...]


def stats_pool(x, *, row_block=256, max_t_block=None, vmem_budget_bytes=4 << 20):
    """x: (B, C, *spatial) -> (B, 2*C), matching torch StatsPool.forward."""
    b, c = x.shape[0], x.shape[1]
    xf = x.reshape(b * c, -1)                 # rows on sublanes, T on lanes (no copy)
    rows, t = xf.shape
    itemsize = xf.dtype.itemsize

    # --- Row tiling (sublane axis): aligned blocks; last block may overhang. ---
    row_align = max(8, 32 // itemsize)
    rb = min(_round_up(row_block, row_align), _round_up(rows, row_align))
    row_tiles = _cdiv(rows, rb)
    rows_out = row_tiles * rb

    # --- T tiling (lane axis): sized from a VMEM byte budget, not a fixed width. ---
    tb_budget = max((vmem_budget_bytes // (rb * itemsize)) // 128 * 128, 128)
    if max_t_block is not None:
        tb_budget = max(min(tb_budget, _round_up(max_t_block, 128)), 128)
    if t <= tb_budget:
        tb, t_tiles = t, 1                    # full-extent block: no T mask needed
    else:
        tb, t_tiles = tb_budget, _cdiv(t, tb_budget)

    # --- Split the T range across 2 cores when there is only one row tile. ---
    n_split = 2 if (row_tiles == 1 and t_tiles >= 2) else 1
    tiles_per_split = _cdiv(t_tiles, n_split)
    ragged = (t_tiles * tb != t) or (n_split * tiles_per_split != t_tiles)

    if n_split * tiles_per_split > t_tiles:
        # Clamp so the (possibly empty) trailing tile of the last split never
        # issues an out-of-bounds DMA; the kernel skips its combine (rem <= 0).
        t_index = lambda s, i, k: (i, jnp.minimum(s * tiles_per_split + k,
                                                  t_tiles - 1))
    else:
        t_index = lambda s, i, k: (i, s * tiles_per_split + k)

    kernel = functools.partial(
        _stats_pool_kernel, t_total=t, t_block=tb,
        tiles_per_split=tiles_per_split, ragged=ragged)

    grid = (n_split, row_tiles, tiles_per_split)
    out_spec = lambda: pl.BlockSpec((None, rb, 1), lambda s, i, k: (s, i, 0))

    cost = pl.CostEstimate(
        flops=4 * rows * t,
        transcendentals=0,
        bytes_accessed=rows * t * itemsize + n_split * rows_out * 2 * 4)

    mean_p, m2_p = pl.pallas_call(
        kernel,
        out_shape=(jax.ShapeDtypeStruct((n_split, rows_out, 1), jnp.float32),
                   jax.ShapeDtypeStruct((n_split, rows_out, 1), jnp.float32)),
        grid_spec=pltpu.PrefetchScalarGridSpec(
            num_scalar_prefetch=0,
            grid=grid,
            in_specs=[pl.BlockSpec((rb, tb), t_index)],
            out_specs=[out_spec(), out_spec()],
            scratch_shapes=[pltpu.VMEM((rb, 1), jnp.float32),
                            pltpu.VMEM((rb, 1), jnp.float32)]),
        compiler_params=pltpu.CompilerParams(
            dimension_semantics=("parallel", "parallel", "arbitrary"),
            vmem_limit_bytes=32 << 20),
        cost_estimate=cost,
    )(xf)

    mean0 = mean_p[0, :rows, 0]
    m2_0 = m2_p[0, :rows, 0]
    if n_split == 2:
        # 2-way Chan combine of the per-core partials (a handful of tiny ops).
        n0 = float(tiles_per_split * tb)      # split 0 is always full tiles
        n1 = float(t) - n0
        mean1 = mean_p[1, :rows, 0]
        m2_1 = m2_p[1, :rows, 0]
        delta = mean1 - mean0
        mean = mean0 + delta * (n1 / t)
        m2 = m2_0 + m2_1 + (delta * delta) * (n0 * n1 / t)
    else:
        mean, m2 = mean0, m2_0

    var = m2 / jnp.float32(t - 1)             # unbiased (ddof=1); T == 1 -> NaN (torch)
    std = jnp.sqrt(var)
    out = jnp.concatenate([mean.reshape(b, c), std.reshape(b, c)], axis=1)
    return out.astype(x.dtype)


def _reference(x):
    b, c = x.shape[0], x.shape[1]
    x3 = x.reshape(b, c, -1)
    mean = jnp.mean(x3, axis=2)
    std = jnp.std(x3, axis=2, ddof=1)         # unbiased, like torch
    return jnp.concatenate([mean, std], axis=1)


if __name__ == "__main__":
    key = jax.random.PRNGKey(0)
    # Small shapes consistent with an NCHW conv feature map.
    B, C, H, W = 2, 4, 16, 16
    x = jax.random.normal(key, (B, C, H, W), dtype=jnp.float32) * 2.0 + 1.5

    out = jax.block_until_ready(stats_pool(x))
    ref = _reference(x)
    assert out.shape == (B, 2 * C), out.shape
    assert jnp.allclose(out, ref, atol=1e-5, rtol=1e-5), (
        f"max abs err {jnp.max(jnp.abs(out - ref))}")

    # Multi-tile T reduction: partial last tile + 2-way core split (odd tile count).
    x2 = jax.random.normal(jax.random.PRNGKey(1), (2, 4, 3000),
                           dtype=jnp.float32) * 3.0 - 2.0
    out2 = jax.block_until_ready(stats_pool(x2, max_t_block=1024))
    ref2 = _reference(x2)
    assert jnp.allclose(out2, ref2, atol=1e-4, rtol=1e-4), (
        f"max abs err {jnp.max(jnp.abs(out2 - ref2))}")

    # Ragged row tiles (rows=21, rb=8) + ragged T tiles, no core split.
    x3 = jax.random.normal(jax.random.PRNGKey(2), (3, 7, 500),
                           dtype=jnp.float32) + 0.25
    out3 = jax.block_until_ready(stats_pool(x3, row_block=8, max_t_block=256))
    ref3 = _reference(x3)
    assert jnp.allclose(out3, ref3, atol=1e-4, rtol=1e-4), (
        f"max abs err {jnp.max(jnp.abs(out3 - ref3))}")

    print("KERNEL_OK")
</pallas_src>

<mosaic_0001>
module attributes {stable_mosaic.version = 11 : i64} {
  func.func @_stats_pool_kernel(%arg0: i32, %arg1: i32, %arg2: i32, %arg3: memref<8x256xf32, #tpu.memory_space<vmem>>, %arg4: memref<1x8x1xf32, #tpu.memory_space<vmem>>, %arg5: memref<1x8x1xf32, #tpu.memory_space<vmem>>, %arg6: memref<8x1xf32, #tpu.memory_space<vmem>>, %arg7: memref<8x1xf32, #tpu.memory_space<vmem>>) attributes {dimension_semantics = [#tpu.dimension_semantics<parallel>, #tpu.dimension_semantics<parallel>, #tpu.dimension_semantics<arbitrary>], iteration_bounds = array<i64: 1, 1, 1>, scalar_prefetch = 0 : i64, scratch_operands = 2 : i64, tpu.core_type = #tpu.core_type<tc>, window_params = [{transform_indices = @transform_0, window_bounds = array<i64: 8, 256>}, {transform_indices = @transform_1, window_bounds = array<i64: 1, 8, 1>}, {transform_indices = @transform_2, window_bounds = array<i64: 1, 8, 1>}]} {
    %c0_i32 = arith.constant 0 : i32
    %0 = arith.cmpi eq, %arg2, %c0_i32 : i32
    %1 = arith.extui %0 : i1 to i32
    %c0_i32_0 = arith.constant 0 : i32
    %2 = arith.cmpi ne, %1, %c0_i32_0 : i32
    scf.if %2 {
      %cst_20 = arith.constant 0.000000e+00 : f32
      %39 = vector.broadcast %cst_20 : f32 to vector<8x1xf32>
      %c0_21 = arith.constant 0 : index
      %c0_22 = arith.constant 0 : index
      %40 = vector.load %arg6[%c0_21, %c0_22] : memref<8x1xf32, #tpu.memory_space<vmem>>, vector<8x1xf32>
      tpu.vector_store %arg6[%c0_21, %c0_22], %39 {strides = array<i32>} : memref<8x1xf32, #tpu.memory_space<vmem>>, vector<8x1xf32>,
      %cst_23 = arith.constant 0.000000e+00 : f32
      %41 = vector.broadcast %cst_23 : f32 to vector<8x1xf32>
      %c0_24 = arith.constant 0 : index
      %c0_25 = arith.constant 0 : index
      %42 = vector.load %arg7[%c0_24, %c0_25] : memref<8x1xf32, #tpu.memory_space<vmem>>, vector<8x1xf32>
      tpu.vector_store %arg7[%c0_24, %c0_25], %41 {strides = array<i32>} : memref<8x1xf32, #tpu.memory_space<vmem>>, vector<8x1xf32>,
    } else {
    }
    %c256_i32 = arith.constant 256 : i32
    %3 = arith.muli %arg0, %c256_i32 : i32
    %c256_i32_1 = arith.constant 256 : i32
    %4 = arith.subi %c256_i32_1, %3 : i32
    %c0_i32_2 = arith.constant 0 : i32
    %5 = arith.maxsi %4, %c0_i32_2 : i32
    %c256_i32_3 = arith.constant 256 : i32
    %6 = arith.muli %arg2, %c256_i32_3 : i32
    %7 = arith.minsi %5, %6 : i32
    %8 = arith.sitofp %7 : i32 to f32
    %c0 = arith.constant 0 : index
    %c0_4 = arith.constant 0 : index
    %9 = vector.load %arg3[%c0, %c0_4] : memref<8x256xf32, #tpu.memory_space<vmem>>, vector<8x256xf32>
    %cst = arith.constant dense<0.000000e+00> : vector<8xf32>
    %10 = vector.multi_reduction <add>, %9, %cst [1] : vector<8x256xf32> to vector<8xf32>
    %11 = vector.shape_cast %10 : vector<8xf32> to vector<8x1xf32>
    %cst_5 = arith.constant 2.560000e+02 : f32
    %12 = vector.broadcast %cst_5 : f32 to vector<8x1xf32>
    %13 = arith.divf %11, %12 : vector<8x1xf32>
    %14 = vector.broadcast %13 : vector<8x1xf32> to vector<8x256xf32>
    %15 = arith.subf %9, %14 : vector<8x256xf32>
    %16 = arith.mulf %15, %15 : vector<8x256xf32>
    %cst_6 = arith.constant dense<0.000000e+00> : vector<8xf32>
    %17 = vector.multi_reduction <add>, %16, %cst_6 [1] : vector<8x256xf32> to vector<8xf32>
    %18 = vector.shape_cast %17 : vector<8xf32> to vector<8x1xf32>
    %c0_7 = arith.constant 0 : index
    %c0_8 = arith.constant 0 : index
    %19 = vector.load %arg6[%c0_7, %c0_8] : memref<8x1xf32, #tpu.memory_space<vmem>>, vector<8x1xf32>
    %c0_9 = arith.constant 0 : index
    %c0_10 = arith.constant 0 : index
    %20 = vector.load %arg7[%c0_9, %c0_10] : memref<8x1xf32, #tpu.memory_space<vmem>>, vector<8x1xf32>
    %cst_11 = arith.constant 2.560000e+02 : f32
    %21 = arith.addf %8, %cst_11 : f32
    %22 = arith.subf %13, %19 : vector<8x1xf32>
    %cst_12 = arith.constant 2.560000e+02 : f32
    %23 = arith.divf %cst_12, %21 : f32
    %24 = vector.broadcast %23 : f32 to vector<8x1xf32>
    %25 = arith.mulf %22, %24 : vector<8x1xf32>
    %26 = arith.addf %19, %25 : vector<8x1xf32>
    %c0_13 = arith.constant 0 : index
    %c0_14 = arith.constant 0 : index
    %27 = vector.load %arg6[%c0_13, %c0_14] : memref<8x1xf32, #tpu.memory_space<vmem>>, vector<8x1xf32>
    tpu.vector_store %arg6[%c0_13, %c0_14], %26 {strides = array<i32>} : memref<8x1xf32, #tpu.memory_space<vmem>>, vector<8x1xf32>,
    %28 = arith.addf %20, %18 : vector<8x1xf32>
    %29 = arith.mulf %22, %22 : vector<8x1xf32>
    %cst_15 = arith.constant 2.560000e+02 : f32
    %30 = arith.mulf %8, %cst_15 : f32
    %31 = arith.divf %30, %21 : f32
    %32 = vector.broadcast %31 : f32 to vector<8x1xf32>
    %33 = arith.mulf %29, %32 : vector<8x1xf32>
    %34 = arith.addf %28, %33 : vector<8x1xf32>
    %c0_16 = arith.constant 0 : index
    %c0_17 = arith.constant 0 : index
    %35 = vector.load %arg7[%c0_16, %c0_17] : memref<8x1xf32, #tpu.memory_space<vmem>>, vector<8x1xf32>
    tpu.vector_store %arg7[%c0_16, %c0_17], %34 {strides = array<i32>} : memref<8x1xf32, #tpu.memory_space<vmem>>, vector<8x1xf32>,
    %c0_i32_18 = arith.constant 0 : i32
    %36 = arith.cmpi eq, %arg2, %c0_i32_18 : i32
    %37 = arith.extui %36 : i1 to i32
    %c0_i32_19 = arith.constant 0 : i32
    %38 = arith.cmpi ne, %37, %c0_i32_19 : i32
    scf.if %38 {
      %c0_20 = arith.constant 0 : index
      %c0_21 = arith.constant 0 : index
      %39 = vector.load %arg6[%c0_20, %c0_21] : memref<8x1xf32, #tpu.memory_space<vmem>>, vector<8x1xf32>
      %c0_22 = arith.constant 0 : index
      %c0_23 = arith.constant 0 : index
      %c0_24 = arith.constant 0 : index
      %40 = vector.load %arg4[%c0_22, %c0_23, %c0_24] : memref<1x8x1xf32, #tpu.memory_space<vmem>>, vector<1x8x1xf32>
      %41 = vector.shape_cast %40 : vector<1x8x1xf32> to vector<8x1xf32>
      %42 = vector.shape_cast %39 : vector<8x1xf32> to vector<1x8x1xf32>
      tpu.vector_store %arg4[%c0_22, %c0_23, %c0_24], %42 {strides = array<i32>} : memref<1x8x1xf32, #tpu.memory_space<vmem>>, vector<1x8x1xf32>,
      %c0_25 = arith.constant 0 : index
      %c0_26 = arith.constant 0 : index
      %43 = vector.load %arg7[%c0_25, %c0_26] : memref<8x1xf32, #tpu.memory_space<vmem>>, vector<8x1xf32>
      %c0_27 = arith.constant 0 : index
      %c0_28 = arith.constant 0 : index
      %c0_29 = arith.constant 0 : index
      %44 = vector.load %arg5[%c0_27, %c0_28, %c0_29] : memref<1x8x1xf32, #tpu.memory_space<vmem>>, vector<1x8x1xf32>
      %45 = vector.shape_cast %44 : vector<1x8x1xf32> to vector<8x1xf32>
      %46 = vector.shape_cast %43 : vector<8x1xf32> to vector<1x8x1xf32>
      tpu.vector_store %arg5[%c0_27, %c0_28, %c0_29], %46 {strides = array<i32>} : memref<1x8x1xf32, #tpu.memory_space<vmem>>, vector<1x8x1xf32>,
    } else {
    }
    return
  }
  func.func @transform_0(%arg0: i32, %arg1: i32, %arg2: i32) -> (i32, i32) {
    %c1_i32 = arith.constant 1 : i32
    %0 = arith.muli %arg0, %c1_i32 : i32
    %1 = arith.addi %0, %arg2 : i32
    %c0_i32 = arith.constant 0 : i32
    return %arg1, %1 : i32, i32
  }
  func.func @transform_1(%arg0: i32, %arg1: i32, %arg2: i32) -> (i32, i32, i32) {
    %c0_i32 = arith.constant 0 : i32
    %c0_i32_0 = arith.constant 0 : i32
    return %arg0, %arg1, %c0_i32 : i32, i32, i32
  }
  func.func @transform_2(%arg0: i32, %arg1: i32, %arg2: i32) -> (i32, i32, i32) {
    %c0_i32 = arith.constant 0 : i32
    %c0_i32_0 = arith.constant 0 : i32
    return %arg0, %arg1, %c0_i32 : i32, i32, i32
  }
}

</mosaic_0001>

<bundles_post_ra>
// kernel: tpu_custom_call.1
= control target key start
LH: loop header
LB: loop body
LE: loop exit
PB: predicated region body
PF: predicated region fallthrough
CT: control target
= control target key end

     0   :  { %8 = vsyncpa [#allocation5], 0  ;;  %s121_s9 = smov [#allocation4]   ;;  %s153_s0 = inlined_call_operand.hbm [shape: f32[8,256], index: 0, kind: input, shape index: {}]   ;;  %s154_s1 = inlined_call_operand.vmem [shape: f32[1,8,1], index: 1, kind: output, shape index: {0}]   ;;  %s155_s2 = inlined_call_operand.vmem [shape: f32[1,8,1], index: 2, kind: output, shape index: {1}]  }
   0x1   :  { %s19_s10 = sshll.u32 %s121_s9, 4  ;;  %s20_s10 = int_to_ptr.vmem [resolvable:$true] %s19_s10 }
   0x2   :  { %s107_s11 = scalar_lea.vmem %s20_s10, 256  ;;  %p112_p1 = scmp.lt.s32.totalorder %s20_s10, %s20_s10 }
   0x3   :  { %p108_p0 = scmp.ne.s32.totalorder %s20_s10, %s107_s11  ;;  %p113_p2 = scmp.lt.s32.totalorder %s107_s11, %s107_s11 }
   0x5   :  { %p114_p3 = por %p113_p2, %p112_p1 }
   0x7   :  { %p115_p4 = pnand %p114_p3, %p108_p0 }
   0x9   :  { %118 = shalt.err (!%p115_p4)
}
   0xa   :  { %22 = dma.hbm_to_vmem [thread:$0]  %s153_s0, 256, %s20_s10, [#allocation5]  }
   0xb   :  { %119 = dma.done.wait [#allocation5], 256  }
   0xc   :  { %120 = vsyncadd [#allocation5], 4294967040  ;;  %vm32_vm0 = vcmask 7168   ;;  %v122_v0 = vmov 0.0   ;;  %v43_v1 = vld [vmem:[#allocation4] sm:$0xff]  ;;  %v44_v2 = vld [vmem:[#allocation4 + $0x8] sm:$0xff] }
   0xd   :  { %33 = vst.msk [vmem:[#allocation2] sm:$0xff] %vm32_vm0, %v122_v0  ;;  %34 = vst.msk [vmem:[#allocation3] sm:$0xff] %vm32_vm0, %v122_v0  ;;  %v45_v3 = vadd.f32 %v44_v2, %v43_v1 }
   0xf   :  { %46 = vadd.xlane.f32.xlu0 %v45_v3 }
  0x14   :  { %v57_v5 = vld [vmem:[#allocation2] sm:$0xff]  ;;  %v58_v16 = vld [vmem:[#allocation3] sm:$0xff] }
  0x98   :  { %v47_v4 = vpop.xlane.xlu0 %46 }
  0x99   :  { %v49_v6 = vmul.f32 0.00390625, %v47_v4 }
  0x9b   :  { %v60_v7 = vsub.f32 %v49_v6, %v57_v5  ;;  %v50_v8 = vsub.f32 %v43_v1, %v49_v6  ;;  %v51_v9 = vsub.f32 %v44_v2, %v49_v6 }
  0x9d   :  { %v67_v10 = vadd.f32 %v60_v7, %v57_v5  ;;  %v52_v11 = vmul.f32 %v50_v8, %v50_v8  ;;  %v53_v12 = vmul.f32 %v51_v9, %v51_v9  ;;  %v71_v15 = vmul.f32 %v60_v7, %v60_v7 }
  0x9f   :  { %69 = vst.msk [vmem:[#allocation2] sm:$0xff] %vm32_vm0, %v67_v10  ;;  %v54_v13 = vadd.f32 %v53_v12, %v52_v11  ;;  %v78_v19 = vmul.f32 0.0, %v71_v15 }
  0xa1   :  { %55 = vadd.xlane.f32.xlu0 %v54_v13 }
  0xa6   :  { %v84_v14 = vld [vmem:[#allocation2] sm:$0xff] }
  0xa7   :  { %85 = vst.msk [vmem:[%s154_s1] sm:$0xff] %vm32_vm0, %v84_v14 }
 0x12a   :  { %v56_v17 = vpop.xlane.xlu0 %55 }
 0x12b   :  { %v70_v18 = vadd.f32 %v58_v16, %v56_v17 }
 0x12d   :  { %v79_v20 = vadd.f32 %v78_v19, %v70_v18 }
 0x12f   :  { %80 = vst.msk [vmem:[#allocation3] sm:$0xff] %vm32_vm0, %v79_v20 }
 0x136   :  { %v86_v21 = vld [vmem:[#allocation3] sm:$0xff] }
 0x137   :  { %87 = vst.msk [vmem:[%s155_s2] sm:$0xff] %vm32_vm0, %v86_v21 }
 0x138   :  { %96 = vsyncpa [#allocation5], 1 }

</bundles_post_ra>
